<compile_context>
chip_gen: v6e
topology: v6e:2x2x1
jax: 0.10.0
libtpu: 0.0.40
codegen_flags: <defaults>
</compile_context>

<pallas_src>
from functools import partial

import numpy as np
import jax
import jax.numpy as jnp
from jax.experimental import pallas as pl
from jax.experimental.pallas import tpu as pltpu

LANE = 128


# ----------------------------------------------------------------------------
# Mask construction
# ----------------------------------------------------------------------------
def compute_masks(state_length, action_no):
    """Original (string-based) reference construction from the PyTorch module."""
    no_qubits_per_action = state_length // action_no
    masks = []
    formatt = "0" + str(state_length) + "b"
    for mask_no in range(action_no):
        mask = []
        for number in range(pow(2, state_length)):
            binary_form = format(number, formatt)
            binary_form = binary_form[::-1]
            start = no_qubits_per_action * mask_no
            end = no_qubits_per_action * (mask_no + 1)
            s = 0
            for index in range(start, end):
                s += int(binary_form[index])
            mask.append(pow(-1, s))
        masks.append(mask)
    return masks


def compute_masks_fast(state_length, action_no):
    """Vectorized bit-parity: mask[a][d] = (-1)^popcount((d >> a*q) & ((1<<q)-1))."""
    q = state_length // action_no
    d = np.arange(1 << state_length, dtype=np.int64)
    rows = []
    for a in range(action_no):
        bits = (d >> (a * q)) & ((1 << q) - 1)
        parity = np.zeros_like(bits)
        for b in range(q):
            parity ^= (bits >> b) & 1
        rows.append(1 - 2 * parity)
    return np.stack(rows).astype(np.float32)  # (A, D), entries +/-1


# ----------------------------------------------------------------------------
# Tile selection
# ----------------------------------------------------------------------------
def _pick_tiles(batch, depth):
    """Pick (tm, tk) so the double-buffered working set stays ~<= 12 MiB,
    which fits the default scoped VMEM on v5e (16 MiB) and v6e/v7x (32 MiB).
    depth is a power of two, so any power-of-two tk <= depth divides it."""
    tm = batch if batch <= 128 else 128
    tk = min(depth, 16384)
    budget = 12 * 1024 * 1024
    # 2x f32 x blocks + 2x (<=128-lane) int8 mask blocks + 2x f32 out blocks.
    while tk > 512 and (2 * tm * tk * 4 + 2 * tk * 128 + 2 * tm * 128 * 4) > budget:
        tk //= 2
    return tm, tk


# ----------------------------------------------------------------------------
# Kernels
# ----------------------------------------------------------------------------
def _mxu_kernel(x_ref, m_ref, o_ref):
    """o[i] += x_block (f32 -> bf16) @ mask_block (int8 -> bf16), f32 accum."""
    @pl.when(pl.program_id(1) == 0)
    def _():
        o_ref[...] = jnp.zeros_like(o_ref)

    o_ref[...] += jnp.dot(
        x_ref[...].astype(jnp.bfloat16),
        m_ref[...].astype(jnp.bfloat16),
        preferred_element_type=jnp.float32,
    )


def _make_vpu_kernel(action_space):
    """Per-action VPU multiply + lane reduction; mask stream is unpadded int8."""

    def kernel(x_ref, m_ref, o_ref):
        @pl.when(pl.program_id(1) == 0)
        def _():
            o_ref[...] = jnp.zeros_like(o_ref)

        x = x_ref[...]                              # (tm, tk) f32
        m = m_ref[...].astype(jnp.float32)          # (A, tk)  +/-1
        cols = []
        for a in range(action_space):               # static unroll, A is tiny
            cols.append(jnp.sum(x * m[a:a + 1, :], axis=1, keepdims=True))
        o_ref[...] += jnp.concatenate(cols, axis=1)  # (tm, A)

    return kernel


# ----------------------------------------------------------------------------
# Jitted forward wrappers (pad + pallas_call + slice fused in one executable)
# ----------------------------------------------------------------------------
@partial(jax.jit, static_argnames=("action_space",))
def _forward_mxu(x2d, masks_t_i8, *, action_space):
    batch, depth = x2d.shape
    a_pad = masks_t_i8.shape[1]
    x2d = x2d.astype(jnp.float32)
    tm, tk = _pick_tiles(batch, depth)
    assert depth % tk == 0
    bpad = pl.cdiv(batch, tm) * tm
    if bpad != batch:
        x2d = jnp.pad(x2d, ((0, bpad - batch), (0, 0)))

    out = pl.pallas_call(
        _mxu_kernel,
        out_shape=jax.ShapeDtypeStruct((bpad, a_pad), jnp.float32),
        grid=(bpad // tm, depth // tk),
        in_specs=[
            pl.BlockSpec((tm, tk), lambda i, k: (i, k)),
            pl.BlockSpec((tk, a_pad), lambda i, k: (k, 0)),
        ],
        out_specs=pl.BlockSpec((tm, a_pad), lambda i, k: (i, 0)),
        compiler_params=pltpu.CompilerParams(
            dimension_semantics=("parallel", "arbitrary")),
    )(x2d, masks_t_i8)
    return out[:batch, :action_space]


@partial(jax.jit, static_argnames=("action_space",))
def _forward_vpu(x2d, masks_i8, *, action_space):
    batch, depth = x2d.shape
    x2d = x2d.astype(jnp.float32)
    tm, tk = _pick_tiles(batch, depth)
    assert depth % tk == 0
    bpad = pl.cdiv(batch, tm) * tm
    if bpad != batch:
        x2d = jnp.pad(x2d, ((0, bpad - batch), (0, 0)))

    out = pl.pallas_call(
        _make_vpu_kernel(action_space),
        out_shape=jax.ShapeDtypeStruct((bpad, action_space), jnp.float32),
        grid=(bpad // tm, depth // tk),
        in_specs=[
            pl.BlockSpec((tm, tk), lambda i, k: (i, k)),
            pl.BlockSpec((action_space, tk), lambda i, k: (0, k)),
        ],
        out_specs=pl.BlockSpec((tm, action_space), lambda i, k: (i, 0)),
        compiler_params=pltpu.CompilerParams(
            dimension_semantics=("parallel", "arbitrary")),
    )(x2d, masks_i8)
    return out[:batch]


# ----------------------------------------------------------------------------
# Layer
# ----------------------------------------------------------------------------
class ExpValLayer:
    """JAX/Pallas port of exp_val_layer (forward: out = x @ masks.T)."""

    def __init__(self, action_space, state_length, key):
        self.action_space = action_space
        self.state_length = state_length
        self.D = 1 << state_length

        # Parameter exists in the PyTorch module but is unused in forward();
        # kept for parity (uniform in [35, 40)).
        self.weights = jax.random.uniform(
            key, (action_space,), dtype=jnp.float32, minval=35.0, maxval=40.0)

        # (A, D) float32 of +/-1 (reference copy, parity with PyTorch).
        masks_np = compute_masks_fast(state_length, action_space)
        self.masks = jnp.asarray(masks_np)

        # VPU-path slab: unpadded (A, D) int8 — minimal HBM mask stream.
        self.masks_i8 = jnp.asarray(masks_np.astype(np.int8))

        # MXU-path slab: transposed, lane-padded (D, A_pad) int8.
        self.A_pad = max(LANE, ((action_space + LANE - 1) // LANE) * LANE)
        m_t = np.zeros((self.D, self.A_pad), dtype=np.int8)
        m_t[:, :action_space] = masks_np.T.astype(np.int8)
        self.masks_T_i8 = jnp.asarray(m_t)

    def _prefer_mxu(self, batch):
        # Crude roofline (per element of D): VPU path costs ~2*A*B VPU elem-ops
        # (4096/cycle) and (4B + ~32) HBM bytes; MXU path streams (4B + 128)
        # HBM bytes (~1500 B/cycle) with negligible MXU time.
        a, b = self.action_space, batch
        vpu_cost = max(2.0 * a * b / 4096.0, (4.0 * b + 32.0) / 1500.0)
        mxu_cost = (4.0 * b + 128.0) / 1500.0
        return mxu_cost < vpu_cost

    def __call__(self, x, path=None):
        squeeze = x.ndim == 1
        x2d = x[None, :] if squeeze else x
        batch, depth = x2d.shape
        assert depth == self.D, f"expected last dim {self.D}, got {depth}"

        use_mxu = (path == "mxu") if path is not None else self._prefer_mxu(batch)
        if use_mxu:
            out = _forward_mxu(x2d, self.masks_T_i8, action_space=self.action_space)
        else:
            out = _forward_vpu(x2d, self.masks_i8, action_space=self.action_space)
        return out[0] if squeeze else out


# ----------------------------------------------------------------------------
# Demo / self-test
# ----------------------------------------------------------------------------
if __name__ == "__main__":
    # Small, consistent shapes: state_length=8 -> D = 2**8 = 256, 4 actions.
    state_length = 8
    action_space = 4
    batch = 8
    D = 2 ** state_length

    key = jax.random.PRNGKey(0)
    k_w, k_x = jax.random.split(key)

    layer = ExpValLayer(action_space, state_length, k_w)

    # Vectorized mask construction matches the original string construction.
    masks_ref = np.asarray(compute_masks(state_length, action_space), dtype=np.float64)
    assert np.array_equal(np.asarray(layer.masks, dtype=np.float64), masks_ref)

    x = jax.random.normal(k_x, (batch, D), dtype=jnp.float32)
    x_np = np.asarray(x, dtype=np.float64)
    ref = x_np @ masks_ref.T                                             # exact
    xq_np = np.asarray(x.astype(jnp.bfloat16).astype(jnp.float32), dtype=np.float64)
    ref_bf16 = xq_np @ masks_ref.T                                       # bf16-quantized x

    # 1) Default path (VPU, unpadded int8 masks): full f32 math.
    out = jax.block_until_ready(layer(x))
    assert out.shape == (batch, action_space)
    assert np.allclose(np.asarray(out), ref, atol=1e-3, rtol=1e-4)

    # 2) MXU path (in-kernel f32->bf16 cast, int8->bf16 masks, f32 accumulate).
    out_mxu = jax.block_until_ready(layer(x, path="mxu"))
    assert out_mxu.shape == (batch, action_space)
    assert np.allclose(np.asarray(out_mxu), ref_bf16, atol=1e-3, rtol=1e-3)
    assert np.allclose(np.asarray(out_mxu), ref, atol=0.2, rtol=2e-2)

    # 3) 1-D input path.
    out1d = jax.block_until_ready(layer(x[0]))
    assert out1d.shape == (action_space,)
    assert np.allclose(np.asarray(out1d), ref[0], atol=1e-3, rtol=1e-4)

    # 4) Batch > 128: exercises the parallel M grid axis + row padding on both paths.
    big = 160
    xb = jax.random.normal(jax.random.PRNGKey(1), (big, D), dtype=jnp.float32)
    ref_big = np.asarray(xb, dtype=np.float64) @ masks_ref.T
    out_big_vpu = jax.block_until_ready(layer(xb, path="vpu"))
    out_big_mxu = jax.block_until_ready(layer(xb, path="mxu"))
    assert out_big_vpu.shape == (big, action_space)
    assert out_big_mxu.shape == (big, action_space)
    assert np.allclose(np.asarray(out_big_vpu), ref_big, atol=1e-3, rtol=1e-4)
    assert np.allclose(np.asarray(out_big_mxu), ref_big, atol=0.2, rtol=2e-2)

    print("KERNEL_OK")
</pallas_src>

<mosaic_0001>
module attributes {stable_mosaic.version = 11 : i64} {
  func.func @kernel(%arg0: i32, %arg1: i32, %arg2: memref<8x256xf32, #tpu.memory_space<vmem>>, %arg3: memref<4x256xi8, #tpu.memory_space<vmem>>, %arg4: memref<8x4xf32, #tpu.memory_space<vmem>>) attributes {dimension_semantics = [#tpu.dimension_semantics<parallel>, #tpu.dimension_semantics<arbitrary>], iteration_bounds = array<i64: 1, 1>, scalar_prefetch = 0 : i64, scratch_operands = 0 : i64, tpu.core_type = #tpu.core_type<tc>, window_params = [{transform_indices = @transform_0, window_bounds = array<i64: 8, 256>}, {transform_indices = @transform_1, window_bounds = array<i64: 4, 256>}, {transform_indices = @transform_2, window_bounds = array<i64: 8, 4>}]} {
    %c0_i32 = arith.constant 0 : i32
    %0 = arith.cmpi eq, %arg1, %c0_i32 : i32
    %1 = arith.extui %0 : i1 to i32
    %c0_i32_0 = arith.constant 0 : i32
    %2 = arith.cmpi ne, %1, %c0_i32_0 : i32
    scf.if %2 {
      %cst_11 = arith.constant 0.000000e+00 : f32
      %30 = vector.broadcast %cst_11 : f32 to vector<8x4xf32>
      %c0_12 = arith.constant 0 : index
      %c0_13 = arith.constant 0 : index
      %31 = vector.load %arg4[%c0_12, %c0_13] : memref<8x4xf32, #tpu.memory_space<vmem>>, vector<8x4xf32>
      tpu.vector_store %arg4[%c0_12, %c0_13], %30 {strides = array<i32>} : memref<8x4xf32, #tpu.memory_space<vmem>>, vector<8x4xf32>,
    } else {
    }
    %c0 = arith.constant 0 : index
    %c0_1 = arith.constant 0 : index
    %3 = vector.load %arg2[%c0, %c0_1] : memref<8x256xf32, #tpu.memory_space<vmem>>, vector<8x256xf32>
    %c0_2 = arith.constant 0 : index
    %c0_3 = arith.constant 0 : index
    %4 = vector.load %arg3[%c0_2, %c0_3] : memref<4x256xi8, #tpu.memory_space<vmem>>, vector<4x256xi8>
    %5 = arith.sitofp %4 : vector<4x256xi8> to vector<4x256xf32>
    %6 = vector.extract_strided_slice %5 {offsets = [0, 0], sizes = [1, 256], strides = [1, 1]} : vector<4x256xf32> to vector<1x256xf32>
    %7 = vector.broadcast %6 : vector<1x256xf32> to vector<8x256xf32>
    %8 = arith.mulf %3, %7 : vector<8x256xf32>
    %cst = arith.constant dense<0.000000e+00> : vector<8xf32>
    %9 = vector.multi_reduction <add>, %8, %cst [1] : vector<8x256xf32> to vector<8xf32>
    %10 = vector.shape_cast %9 : vector<8xf32> to vector<8x1xf32>
    %11 = vector.extract_strided_slice %5 {offsets = [1, 0], sizes = [1, 256], strides = [1, 1]} : vector<4x256xf32> to vector<1x256xf32>
    %12 = vector.broadcast %11 : vector<1x256xf32> to vector<8x256xf32>
    %13 = arith.mulf %3, %12 : vector<8x256xf32>
    %cst_4 = arith.constant dense<0.000000e+00> : vector<8xf32>
    %14 = vector.multi_reduction <add>, %13, %cst_4 [1] : vector<8x256xf32> to vector<8xf32>
    %15 = vector.shape_cast %14 : vector<8xf32> to vector<8x1xf32>
    %16 = vector.extract_strided_slice %5 {offsets = [2, 0], sizes = [1, 256], strides = [1, 1]} : vector<4x256xf32> to vector<1x256xf32>
    %17 = vector.broadcast %16 : vector<1x256xf32> to vector<8x256xf32>
    %18 = arith.mulf %3, %17 : vector<8x256xf32>
    %cst_5 = arith.constant dense<0.000000e+00> : vector<8xf32>
    %19 = vector.multi_reduction <add>, %18, %cst_5 [1] : vector<8x256xf32> to vector<8xf32>
    %20 = vector.shape_cast %19 : vector<8xf32> to vector<8x1xf32>
    %21 = vector.extract_strided_slice %5 {offsets = [3, 0], sizes = [1, 256], strides = [1, 1]} : vector<4x256xf32> to vector<1x256xf32>
    %22 = vector.broadcast %21 : vector<1x256xf32> to vector<8x256xf32>
    %23 = arith.mulf %3, %22 : vector<8x256xf32>
    %cst_6 = arith.constant dense<0.000000e+00> : vector<8xf32>
    %24 = vector.multi_reduction <add>, %23, %cst_6 [1] : vector<8x256xf32> to vector<8xf32>
    %25 = vector.shape_cast %24 : vector<8xf32> to vector<8x1xf32>
    %c0_7 = arith.constant 0 : index
    %c0_8 = arith.constant 0 : index
    %26 = vector.load %arg4[%c0_7, %c0_8] : memref<8x4xf32, #tpu.memory_space<vmem>>, vector<8x4xf32>
    %27 = tpu.concatenate %10, %15, %20, %25 in 1 : vector<8x1xf32>, vector<8x1xf32>, vector<8x1xf32>, vector<8x1xf32> -> vector<8x4xf32>
    %28 = arith.addf %26, %27 : vector<8x4xf32>
    %c0_9 = arith.constant 0 : index
    %c0_10 = arith.constant 0 : index
    %29 = vector.load %arg4[%c0_9, %c0_10] : memref<8x4xf32, #tpu.memory_space<vmem>>, vector<8x4xf32>
    tpu.vector_store %arg4[%c0_9, %c0_10], %28 {strides = array<i32>} : memref<8x4xf32, #tpu.memory_space<vmem>>, vector<8x4xf32>,
    return
  }
  func.func @transform_0(%arg0: i32, %arg1: i32) -> (i32, i32) {
    %c0_i32 = arith.constant 0 : i32
    return %arg0, %arg1 : i32, i32
  }
  func.func @transform_1(%arg0: i32, %arg1: i32) -> (i32, i32) {
    %c0_i32 = arith.constant 0 : i32
    %c0_i32_0 = arith.constant 0 : i32
    return %c0_i32, %arg1 : i32, i32
  }
  func.func @transform_2(%arg0: i32, %arg1: i32) -> (i32, i32) {
    %c0_i32 = arith.constant 0 : i32
    %c0_i32_0 = arith.constant 0 : i32
    return %arg0, %c0_i32 : i32, i32
  }
}

</mosaic_0001>

<bundles_post_ra>
// kernel: _forward_vpu.1
= control target key start
LH: loop header
LB: loop body
LE: loop exit
PB: predicated region body
PF: predicated region fallthrough
CT: control target
= control target key end

     0   :  { %7 = vsyncpa [#allocation3], 0  ;;  %s237_s0 = inlined_call_operand.hbm [shape: f32[8,256], index: 0, kind: input, shape index: {}]   ;;  %s238_s1 = inlined_call_operand.hbm [shape: s8[4,256], index: 1, kind: input, shape index: {}]   ;;  %s239_s2 = inlined_call_operand.vmem [shape: f32[8,4], index: 2, kind: output, shape index: {}]  }
   0x1   :  { %8 = vsyncpa [#allocation5], 0  ;;  %s202_s9 = smov [#allocation2]   ;;  %s203_s11 = smov [#allocation4]  }
   0x2   :  { %s15_s10 = sshll.u32 %s202_s9, 4  ;;  %s25_s12 = sshll.u32 %s203_s11, 4  ;;  %s16_s10 = int_to_ptr.vmem [resolvable:$true] %s15_s10  ;;  %s26_s12 = int_to_ptr.vmem [resolvable:$true] %s25_s12 }
   0x3   :  { %s166_s13 = scalar_lea.vmem %s16_s10, 256  ;;  %p171_p1 = scmp.lt.s32.totalorder %s16_s10, %s16_s10 }
   0x4   :  { %p167_p0 = scmp.ne.s32.totalorder %s16_s10, %s166_s13  ;;  %p172_p2 = scmp.lt.s32.totalorder %s166_s13, %s166_s13 }
   0x6   :  { %p173_p3 = por %p172_p2, %p171_p1 }
   0x8   :  { %p174_p4 = pnand %p173_p3, %p167_p0 }
   0xa   :  { %177 = shalt.err (!%p174_p4)
}
   0xb   :  { %18 = dma.hbm_to_vmem [thread:$0]  %s237_s0, 256, %s16_s10, [#allocation3]  }
   0xc   :  { %s186_s16 = scalar_lea.vmem %s26_s12, 32  ;;  %p191_p6 = scmp.lt.s32.totalorder %s26_s12, %s26_s12 }
   0xd   :  { %p187_p5 = scmp.ne.s32.totalorder %s26_s12, %s186_s16  ;;  %p192_p7 = scmp.lt.s32.totalorder %s186_s16, %s186_s16 }
   0xf   :  { %p193_p8 = por %p192_p7, %p191_p6 }
  0x11   :  { %p194_p9 = pnand %p193_p8, %p187_p5 }
  0x13   :  { %197 = shalt.err (!%p194_p9)
}
  0x14   :  { %28 = dma.hbm_to_vmem [thread:$0]  %s238_s1, 32, %s26_s12, [#allocation5]  }
  0x15   :  { %198 = dma.done.wait [#allocation3], 256  }
  0x16   :  { %199 = vsyncadd [#allocation3], 4294967040 }
  0x17   :  { %200 = dma.done.wait [#allocation5], 32  }
  0x18   :  { %201 = vsyncadd [#allocation5], 4294967264  ;;  %vm39_vm0 = vcmask 31744   ;;  %v47_v0 = vlaneseq  ;;  %v204_v1 = vmov 0.0   ;;  %v43_v3 = vld [vmem:[#allocation4] sm:$0x3] }
  0x19   :  { %40 = vst.msk [vmem:[%s239_s2] sm:$0xff] %vm39_vm0, %v204_v1  ;;  %v44_v5 = vunpack.c.0.s8 %v43_v3  ;;  %v41_v18 = vld [vmem:[#allocation2] sm:$0xff]  ;;  %v42_v19 = vld [vmem:[#allocation2 + $0x8] sm:$0xff]  ;;  %vm140_vm1 = vcmask 7168   ;;  %vm142_vm2 = vcmask 15360   ;;  %vm144_vm3 = vcmask 23552  }
  0x1a   :  { %v48_v2 = vshrl.u32 %v47_v0, 7 }
  0x1b   :  { %v45_v13 = vcvt.s32.f32 %v44_v5 }
  0x1c   :  { %v49_v4 = vsub.s32 0, %v48_v2  ;;  %v53_v6 = vsub.s32 4, %v48_v2  ;;  %v95_v7 = vsub.s32 2, %v48_v2  ;;  %v99_v8 = vsub.s32 6, %v48_v2 }
  0x1d   :  { %v72_v9 = vsub.s32 1, %v48_v2  ;;  %v76_v10 = vsub.s32 5, %v48_v2  ;;  %v118_v11 = vsub.s32 3, %v48_v2  ;;  %v122_v12 = vsub.s32 7, %v48_v2 }
  0x1e   :  { %v50_v14 = vrot.slane %v45_v13, %v49_v4  ;;  %v54_v15 = vrot.slane %v45_v13, %v53_v6  ;;  %v96_v16 = vrot.slane %v45_v13, %v95_v7  ;;  %v100_v17 = vrot.slane %v45_v13, %v99_v8 }
  0x1f   :  { %v73_v20 = vrot.slane %v45_v13, %v72_v9  ;;  %v77_v21 = vrot.slane %v45_v13, %v76_v10  ;;  %v119_v22 = vrot.slane %v45_v13, %v118_v11  ;;  %v123_v23 = vrot.slane %v45_v13, %v122_v12 }
  0x20   :  { %v60_v24 = vrot.slane %v50_v14, %v49_v4  ;;  %v64_v25 = vrot.slane %v54_v15, %v49_v4  ;;  %v106_v26 = vrot.slane %v96_v16, %v95_v7  ;;  %v110_v27 = vrot.slane %v100_v17, %v95_v7  ;;  %v139_v49 = vld [vmem:[%s239_s2] sm:$0xff] }
  0x21   :  { %v83_v28 = vrot.slane %v73_v20, %v72_v9  ;;  %v87_v29 = vrot.slane %v77_v21, %v72_v9  ;;  %v129_v30 = vrot.slane %v119_v22, %v118_v11  ;;  %v133_v31 = vrot.slane %v123_v23, %v118_v11 }
  0x22   :  { %v65_v32 = vmul.f32 %v60_v24, %v41_v18  ;;  %v66_v33 = vmul.f32 %v64_v25, %v42_v19  ;;  %v111_v34 = vmul.f32 %v106_v26, %v41_v18  ;;  %v112_v35 = vmul.f32 %v110_v27, %v42_v19 }
  0x23   :  { %v88_v36 = vmul.f32 %v83_v28, %v41_v18  ;;  %v89_v37 = vmul.f32 %v87_v29, %v42_v19  ;;  %v134_v38 = vmul.f32 %v129_v30, %v41_v18  ;;  %v135_v39 = vmul.f32 %v133_v31, %v42_v19 }
  0x24   :  { %v67_v40 = vadd.f32 %v66_v33, %v65_v32  ;;  %v113_v41 = vadd.f32 %v112_v35, %v111_v34 }
  0x25   :  { %v90_v42 = vadd.f32 %v89_v37, %v88_v36  ;;  %v136_v43 = vadd.f32 %v135_v39, %v134_v38 }
  0x26   :  { %68 = vadd.xlane.f32.xlu0 %v67_v40  ;;  %114 = vadd.xlane.f32.xlu1 %v113_v41 }
  0x2a   :  { %91 = vadd.xlane.f32.xlu0 %v90_v42  ;;  %137 = vadd.xlane.f32.xlu1 %v136_v43 }
  0xaf   :  { %v69_v44 = vpop.xlane.xlu0 %68  ;;  %v115_v45 = vpop.xlane.xlu1 %114 }
  0xb3   :  { %v92_v46 = vpop.xlane.xlu0 %91  ;;  %v138_v47 = vpop.xlane.xlu1 %137 }
  0xb4   :  { %v141_v48 = vsel %vm140_vm1, %v69_v44, %v92_v46 }
  0xb5   :  { %v143_v50 = vsel %vm142_vm2, %v141_v48, %v115_v45 }
  0xb6   :  { %v145_v51 = vsel %vm144_vm3, %v143_v50, %v138_v47 }
  0xb7   :  { %v146_v52 = vadd.f32 %v145_v51, %v139_v49 }
  0xb9   :  { %148 = vst.msk [vmem:[%s239_s2] sm:$0xff] %vm39_vm0, %v146_v52 }
  0xba   :  { %153 = vsyncpa [#allocation3], 1 }
  0xbb   :  { %154 = vsyncpa [#allocation5], 1 }

</bundles_post_ra>
